<compile_context>
chip_gen: v7x
topology: tpu7x:2x2x1
jax: 0.10.0
libtpu: 0.0.40
codegen_flags: <defaults>
</compile_context>

<pallas_src>
import jax
import jax.numpy as jnp
from jax.experimental import pallas as pl
from jax.experimental.pallas import tpu as pltpu


def _round_up(n, m):
    return ((n + m - 1) // m) * m


def _fpu_kernel(mf_ref, x_ref, w1_ref, b1_ref, w2a_ref, w2b_ref, b2_ref,
                w3_ref, b3_ref, out_ref):
    cd = w1_ref.dtype                       # MXU operand dtype (bf16 or f32)
    mf = mf_ref[...].astype(cd)             # (tm, L), cast in-kernel (no extra HBM pass)
    xx = x_ref[...].astype(cd)              # (tm, L)

    # Layer 1: relu(mf @ W1 + b1)
    h1 = jnp.dot(mf, w1_ref[...], preferred_element_type=jnp.float32) + b1_ref[...]
    h1 = jnp.maximum(h1, 0.0).astype(cd)

    # Layer 2: relu(h1 @ W2a + x @ W2b + b2) == relu(cat([h1, x]) @ W2 + b2)
    h2 = (jnp.dot(h1, w2a_ref[...], preferred_element_type=jnp.float32)
          + jnp.dot(xx, w2b_ref[...], preferred_element_type=jnp.float32)
          + b2_ref[...])
    h2 = jnp.maximum(h2, 0.0).astype(cd)

    # Layer 3: h2 @ W3 + b3
    out = jnp.dot(h2, w3_ref[...], preferred_element_type=jnp.float32) + b3_ref[...]
    out_ref[...] = out.astype(out_ref.dtype)


def frequency_prediction_unit(main_frequencies, x, params, *,
                              tm=2048, compute_dtype=jnp.bfloat16,
                              out_dtype=None):
    """main_frequencies, x: (B, F, L) -> (B, F, H)."""
    B, F, L = x.shape
    H = params["w3"].shape[1]
    M = B * F
    cd = compute_dtype
    out_dtype = x.dtype if out_dtype is None else out_dtype

    mf2 = main_frequencies.reshape(M, L)    # read directly as f32; cast in kernel
    x2 = x.reshape(M, L)

    # Output lane padding only when H is already near a multiple of 128.
    # For small H (e.g. 8) write (M, H) directly: masked stores beat the 16x
    # write inflation of a 128-lane pad plus a wrapper slice pass.
    Hp = _round_up(H, 128)
    if (Hp - H) * 4 > Hp:                   # padding would exceed ~25% of width
        Hp = H

    # Weight layout prep (tiny; constant-folded under jit).
    w1 = params["w1"].astype(cd)                                   # (L, 64)
    w2 = params["w2"]
    w2a = w2[:64].astype(cd)                                       # (64, 128)
    w2b = w2[64:].astype(cd)                                       # (L, 128)
    w3 = params["w3"]
    b3 = params["b3"].reshape(1, H)
    if Hp != H:
        w3 = jnp.pad(w3, ((0, 0), (0, Hp - H)))
        b3 = jnp.pad(b3, ((0, 0), (0, Hp - H)))
    w3 = w3.astype(cd)                                             # (128, Hp)
    b1 = params["b1"].reshape(1, 64).astype(jnp.float32)
    b2 = params["b2"].reshape(1, 128).astype(jnp.float32)
    b3 = b3.astype(jnp.float32)                                    # (1, Hp)

    # Row tile: large to amortize per-step overhead; sublane granularity 16 for
    # bf16 operands (packed (16,128) vregs), 8 for f32. Ragged tails are handled
    # by the cdiv grid (masked boundary DMAs) -- no input padding.
    sub = 8 * (4 // jnp.dtype(cd).itemsize)
    tm_eff = min(_round_up(tm, sub), _round_up(M, sub))
    # Keep >= 2 grid steps when M allows it so v7x's second TensorCore gets
    # work via the "parallel" axis; costs at most ~0.35 us on 1-TC chips.
    if M > sub:
        tm_eff = min(tm_eff, _round_up(pl.cdiv(M, 2), sub))
    grid = (pl.cdiv(M, tm_eff),)

    out = pl.pallas_call(
        _fpu_kernel,
        out_shape=jax.ShapeDtypeStruct((M, Hp), out_dtype),
        grid_spec=pltpu.PrefetchScalarGridSpec(
            num_scalar_prefetch=0,
            grid=grid,
            in_specs=[
                pl.BlockSpec((tm_eff, L), lambda i: (i, 0)),   # main_frequencies rows
                pl.BlockSpec((tm_eff, L), lambda i: (i, 0)),   # x rows
                pl.BlockSpec((L, 64), lambda i: (0, 0)),       # W1
                pl.BlockSpec((1, 64), lambda i: (0, 0)),       # b1
                pl.BlockSpec((64, 128), lambda i: (0, 0)),     # W2a
                pl.BlockSpec((L, 128), lambda i: (0, 0)),      # W2b
                pl.BlockSpec((1, 128), lambda i: (0, 0)),      # b2
                pl.BlockSpec((128, Hp), lambda i: (0, 0)),     # W3 (padded iff Hp != H)
                pl.BlockSpec((1, Hp), lambda i: (0, 0)),       # b3
            ],
            out_specs=pl.BlockSpec((tm_eff, Hp), lambda i: (i, 0)),
        ),
        compiler_params=pltpu.CompilerParams(
            dimension_semantics=("parallel",)),
    )(mf2, x2, w1, b1, w2a, w2b, b2, w3, b3)

    if Hp != H:
        out = out[:, :H]
    return out.reshape(B, F, H)


def init_params(key, lookback_window, forecasting_horizon):
    """Deterministic init mirroring nn.Linear shapes (weights stored transposed:
    (in, out), so y = x @ W + b)."""
    L, H = lookback_window, forecasting_horizon
    k1, k2, k3, k4, k5, k6 = jax.random.split(key, 6)

    def uniform(k, shape, fan_in):
        bound = 1.0 / jnp.sqrt(fan_in)
        return jax.random.uniform(k, shape, jnp.float32, -bound, bound)

    return {
        "w1": uniform(k1, (L, 64), L),             # Linear(L, 64)
        "b1": uniform(k2, (1, 64), L),
        "w2": uniform(k3, (64 + L, 128), 64 + L),  # Linear(64+L, 128)
        "b2": uniform(k4, (1, 128), 64 + L),
        "w3": uniform(k5, (128, H), 128),          # Linear(128, H)
        "b3": uniform(k6, (1, H), 128),
    }


def reference(main_frequencies, x, params):
    """Pure-JAX reference matching the PyTorch forward exactly."""
    h1 = jax.nn.relu(main_frequencies @ params["w1"] + params["b1"])
    cat = jnp.concatenate([h1, x], axis=-1)
    h2 = jax.nn.relu(cat @ params["w2"] + params["b2"])
    return h2 @ params["w3"] + params["b3"]


if __name__ == "__main__":
    # Small shapes consistent with the module: batch=2, num_features=4,
    # lookback_window=16, forecasting_horizon=8.
    B, F, L, H = 2, 4, 16, 8

    key = jax.random.PRNGKey(0)
    k_params, k_mf, k_x = jax.random.split(key, 3)

    params = init_params(k_params, lookback_window=L, forecasting_horizon=H)
    main_frequencies = jax.random.normal(k_mf, (B, F, L), jnp.float32)
    x = jax.random.normal(k_x, (B, F, L), jnp.float32)

    ref = reference(main_frequencies, x, params)

    # Exact-precision path (f32 MXU operands) — tight check of kernel structure.
    out_f32 = frequency_prediction_unit(main_frequencies, x, params,
                                        compute_dtype=jnp.float32)
    out_f32 = jax.block_until_ready(out_f32)
    assert out_f32.shape == (B, F, H), out_f32.shape
    assert jnp.allclose(out_f32, ref, atol=1e-5, rtol=1e-5), "f32 mismatch vs reference"

    # Default fast path (bf16 MXU operands, f32 accumulation) — looser tolerance.
    out_bf16 = frequency_prediction_unit(main_frequencies, x, params)
    out_bf16 = jax.block_until_ready(out_bf16)
    assert out_bf16.shape == (B, F, H), out_bf16.shape
    assert jnp.allclose(out_bf16, ref, atol=3e-2, rtol=3e-2), "bf16 mismatch vs reference"

    print("KERNEL_OK")
</pallas_src>

<mosaic_0001>
module attributes {stable_mosaic.version = 11 : i64} {
  func.func @_fpu_kernel(%arg0: i32, %arg1: memref<8x16xf32, #tpu.memory_space<vmem>>, %arg2: memref<8x16xf32, #tpu.memory_space<vmem>>, %arg3: memref<16x64xf32, #tpu.memory_space<vmem>>, %arg4: memref<1x64xf32, #tpu.memory_space<vmem>>, %arg5: memref<64x128xf32, #tpu.memory_space<vmem>>, %arg6: memref<16x128xf32, #tpu.memory_space<vmem>>, %arg7: memref<1x128xf32, #tpu.memory_space<vmem>>, %arg8: memref<128x8xf32, #tpu.memory_space<vmem>>, %arg9: memref<1x8xf32, #tpu.memory_space<vmem>>, %arg10: memref<8x8xf32, #tpu.memory_space<vmem>>) attributes {dimension_semantics = [#tpu.dimension_semantics<parallel>], iteration_bounds = array<i64: 1>, scalar_prefetch = 0 : i64, scratch_operands = 0 : i64, tpu.core_type = #tpu.core_type<tc>, window_params = [{transform_indices = @transform_0, window_bounds = array<i64: 8, 16>}, {transform_indices = @transform_1, window_bounds = array<i64: 8, 16>}, {pipeline_mode = #tpu.pipeline_mode<synchronous>, transform_indices = @transform_2, window_bounds = array<i64: 16, 64>}, {pipeline_mode = #tpu.pipeline_mode<synchronous>, transform_indices = @transform_3, window_bounds = array<i64: 1, 64>}, {pipeline_mode = #tpu.pipeline_mode<synchronous>, transform_indices = @transform_4, window_bounds = array<i64: 64, 128>}, {pipeline_mode = #tpu.pipeline_mode<synchronous>, transform_indices = @transform_5, window_bounds = array<i64: 16, 128>}, {pipeline_mode = #tpu.pipeline_mode<synchronous>, transform_indices = @transform_6, window_bounds = array<i64: 1, 128>}, {pipeline_mode = #tpu.pipeline_mode<synchronous>, transform_indices = @transform_7, window_bounds = array<i64: 128, 8>}, {pipeline_mode = #tpu.pipeline_mode<synchronous>, transform_indices = @transform_8, window_bounds = array<i64: 1, 8>}, {transform_indices = @transform_9, window_bounds = array<i64: 8, 8>}]} {
    %c0 = arith.constant 0 : index
    %c0_0 = arith.constant 0 : index
    %0 = vector.load %arg1[%c0, %c0_0] : memref<8x16xf32, #tpu.memory_space<vmem>>, vector<8x16xf32>
    %c0_1 = arith.constant 0 : index
    %c0_2 = arith.constant 0 : index
    %1 = vector.load %arg2[%c0_1, %c0_2] : memref<8x16xf32, #tpu.memory_space<vmem>>, vector<8x16xf32>
    %c0_3 = arith.constant 0 : index
    %c0_4 = arith.constant 0 : index
    %2 = vector.load %arg3[%c0_3, %c0_4] : memref<16x64xf32, #tpu.memory_space<vmem>>, vector<16x64xf32>
    %cst = arith.constant dense<0.000000e+00> : vector<8x64xf32>
    %3 = tpu.matmul %0, %2, %cst {dimension_numbers = #tpu.dot_dimension_numbers<[1], [0], [0], [1], [0, 0, 1, 1], [], []>} : vector<8x16xf32>, vector<16x64xf32>, vector<8x64xf32> -> vector<8x64xf32>
    %c0_5 = arith.constant 0 : index
    %c0_6 = arith.constant 0 : index
    %4 = vector.load %arg4[%c0_5, %c0_6] : memref<1x64xf32, #tpu.memory_space<vmem>>, vector<1x64xf32>
    %5 = vector.broadcast %4 : vector<1x64xf32> to vector<8x64xf32>
    %6 = arith.addf %3, %5 : vector<8x64xf32>
    %cst_7 = arith.constant 0.000000e+00 : f32
    %7 = vector.broadcast %cst_7 : f32 to vector<8x64xf32>
    %8 = arith.maximumf %6, %7 : vector<8x64xf32>
    %c0_8 = arith.constant 0 : index
    %c0_9 = arith.constant 0 : index
    %9 = vector.load %arg5[%c0_8, %c0_9] : memref<64x128xf32, #tpu.memory_space<vmem>>, vector<64x128xf32>
    %cst_10 = arith.constant dense<0.000000e+00> : vector<8x128xf32>
    %10 = tpu.matmul %8, %9, %cst_10 {dimension_numbers = #tpu.dot_dimension_numbers<[1], [0], [0], [1], [0, 0, 1, 1], [], []>} : vector<8x64xf32>, vector<64x128xf32>, vector<8x128xf32> -> vector<8x128xf32>
    %c0_11 = arith.constant 0 : index
    %c0_12 = arith.constant 0 : index
    %11 = vector.load %arg6[%c0_11, %c0_12] : memref<16x128xf32, #tpu.memory_space<vmem>>, vector<16x128xf32>
    %cst_13 = arith.constant dense<0.000000e+00> : vector<8x128xf32>
    %12 = tpu.matmul %1, %11, %cst_13 {dimension_numbers = #tpu.dot_dimension_numbers<[1], [0], [0], [1], [0, 0, 1, 1], [], []>} : vector<8x16xf32>, vector<16x128xf32>, vector<8x128xf32> -> vector<8x128xf32>
    %13 = arith.addf %10, %12 : vector<8x128xf32>
    %c0_14 = arith.constant 0 : index
    %c0_15 = arith.constant 0 : index
    %14 = vector.load %arg7[%c0_14, %c0_15] : memref<1x128xf32, #tpu.memory_space<vmem>>, vector<1x128xf32>
    %15 = vector.broadcast %14 : vector<1x128xf32> to vector<8x128xf32>
    %16 = arith.addf %13, %15 : vector<8x128xf32>
    %cst_16 = arith.constant 0.000000e+00 : f32
    %17 = vector.broadcast %cst_16 : f32 to vector<8x128xf32>
    %18 = arith.maximumf %16, %17 : vector<8x128xf32>
    %c0_17 = arith.constant 0 : index
    %c0_18 = arith.constant 0 : index
    %19 = vector.load %arg8[%c0_17, %c0_18] : memref<128x8xf32, #tpu.memory_space<vmem>>, vector<128x8xf32>
    %cst_19 = arith.constant dense<0.000000e+00> : vector<8x8xf32>
    %20 = tpu.matmul %18, %19, %cst_19 {dimension_numbers = #tpu.dot_dimension_numbers<[1], [0], [0], [1], [0, 0, 1, 1], [], []>} : vector<8x128xf32>, vector<128x8xf32>, vector<8x8xf32> -> vector<8x8xf32>
    %c0_20 = arith.constant 0 : index
    %c0_21 = arith.constant 0 : index
    %21 = vector.load %arg9[%c0_20, %c0_21] : memref<1x8xf32, #tpu.memory_space<vmem>>, vector<1x8xf32>
    %22 = vector.broadcast %21 : vector<1x8xf32> to vector<8x8xf32>
    %23 = arith.addf %20, %22 : vector<8x8xf32>
    %c0_22 = arith.constant 0 : index
    %c0_23 = arith.constant 0 : index
    %24 = vector.load %arg10[%c0_22, %c0_23] : memref<8x8xf32, #tpu.memory_space<vmem>>, vector<8x8xf32>
    tpu.vector_store %arg10[%c0_22, %c0_23], %23 {strides = array<i32>} : memref<8x8xf32, #tpu.memory_space<vmem>>, vector<8x8xf32>,
    return
  }
  func.func @transform_0(%arg0: i32) -> (i32, i32) {
    %c0_i32 = arith.constant 0 : i32
    %c0_i32_0 = arith.constant 0 : i32
    return %arg0, %c0_i32 : i32, i32
  }
  func.func @transform_1(%arg0: i32) -> (i32, i32) {
    %c0_i32 = arith.constant 0 : i32
    %c0_i32_0 = arith.constant 0 : i32
    return %arg0, %c0_i32 : i32, i32
  }
  func.func @transform_2(%arg0: i32) -> (i32, i32) {
    %c0_i32 = arith.constant 0 : i32
    %c0_i32_0 = arith.constant 0 : i32
    %c0_i32_1 = arith.constant 0 : i32
    return %c0_i32, %c0_i32_0 : i32, i32
  }
  func.func @transform_3(%arg0: i32) -> (i32, i32) {
    %c0_i32 = arith.constant 0 : i32
    %c0_i32_0 = arith.constant 0 : i32
    %c0_i32_1 = arith.constant 0 : i32
    return %c0_i32, %c0_i32_0 : i32, i32
  }
  func.func @transform_4(%arg0: i32) -> (i32, i32) {
    %c0_i32 = arith.constant 0 : i32
    %c0_i32_0 = arith.constant 0 : i32
    %c0_i32_1 = arith.constant 0 : i32
    return %c0_i32, %c0_i32_0 : i32, i32
  }
  func.func @transform_5(%arg0: i32) -> (i32, i32) {
    %c0_i32 = arith.constant 0 : i32
    %c0_i32_0 = arith.constant 0 : i32
    %c0_i32_1 = arith.constant 0 : i32
    return %c0_i32, %c0_i32_0 : i32, i32
  }
  func.func @transform_6(%arg0: i32) -> (i32, i32) {
    %c0_i32 = arith.constant 0 : i32
    %c0_i32_0 = arith.constant 0 : i32
    %c0_i32_1 = arith.constant 0 : i32
    return %c0_i32, %c0_i32_0 : i32, i32
  }
  func.func @transform_7(%arg0: i32) -> (i32, i32) {
    %c0_i32 = arith.constant 0 : i32
    %c0_i32_0 = arith.constant 0 : i32
    %c0_i32_1 = arith.constant 0 : i32
    return %c0_i32, %c0_i32_0 : i32, i32
  }
  func.func @transform_8(%arg0: i32) -> (i32, i32) {
    %c0_i32 = arith.constant 0 : i32
    %c0_i32_0 = arith.constant 0 : i32
    %c0_i32_1 = arith.constant 0 : i32
    return %c0_i32, %c0_i32_0 : i32, i32
  }
  func.func @transform_9(%arg0: i32) -> (i32, i32) {
    %c0_i32 = arith.constant 0 : i32
    %c0_i32_0 = arith.constant 0 : i32
    return %arg0, %c0_i32 : i32, i32
  }
}

</mosaic_0001>

<bundles_post_ra>
// kernel: tpu_custom_call.1
= control target key start
LH: loop header
LB: loop body
LE: loop exit
PB: predicated region body
PF: predicated region fallthrough
CT: control target
= control target key end

     0   :  { %v570_v2 = vmov 0.0|0.0   ;;  %vm571_vm0 = vmmov 0   ;;  %v572_v4 = vmov 0.0   ;;  %vm44_vm1 = vcmask 130048   ;;  %s753_s0 = inlined_call_operand.vmem [shape: f32[8,16], index: 0, kind: input, shape index: {}]   ;;  %s754_s1 = inlined_call_operand.vmem [shape: f32[8,16], index: 1, kind: input, shape index: {}]   ;;  %s755_s2 = inlined_call_operand.vmem [shape: f32[16,64], index: 2, kind: input, shape index: {}]   ;;  %s756_s3 = inlined_call_operand.vmem [shape: f32[1,64], index: 3, kind: input, shape index: {}]   ;;  %s757_s4 = inlined_call_operand.vmem [shape: f32[64,128], index: 4, kind: input, shape index: {}]   ;;  %s758_s5 = inlined_call_operand.vmem [shape: f32[16,128], index: 5, kind: input, shape index: {}]   ;;  %s759_s6 = inlined_call_operand.vmem [shape: f32[1,128], index: 6, kind: input, shape index: {}]   ;;  %s760_s7 = inlined_call_operand.vmem [shape: f32[128,8], index: 7, kind: input, shape index: {}]   ;;  %s761_s8 = inlined_call_operand.vmem [shape: f32[1,8], index: 8, kind: input, shape index: {}]   ;;  %s762_s9 = inlined_call_operand.hbm [shape: f32[8,8], index: 9, kind: output, shape index: {}]  }
   0x1   :  { %v35_v0 = vld [vmem:[%s755_s2] sm:$0xff]  ;;  %v36_v1 = vld [vmem:[%s755_s2 + $0x8] sm:$0xff]  ;;  %500 = vmatprep.subr.bf16.mxu0 %v570_v2  ;;  %436 = vmatprep.mubr.msk.f32.mxu0 %vm571_vm0, %v572_v4 }
   0x2   :  { %v501_v3 = vpack.c.bf16 %v36_v1, %v35_v0  ;;  %v127_v5 = vld [vmem:[%s758_s5] sm:$0xff]  ;;  %v128_v6 = vld [vmem:[%s758_s5 + $0x8] sm:$0xff]  ;;  %518 = vmatprep.subr.bf16.mxu1 %v570_v2  ;;  %497 = vmatprep.mubr.msk.f32.mxu1 %vm571_vm0, %v572_v4 }
   0x3   :  { %v33_v7 = vld [vmem:[%s753_s0] sm:$0xff]  ;;  %v504_v8 = vpack.c.bf16 %v128_v6, %v127_v5  ;;  %v120_v10 = vld [vmem:[%s757_s4 + $0x8] sm:$0xff] }
   0x4   :  { %502 = vmatpush3.bf16.msra.mxu0 %v501_v3  ;;  %v119_v9 = vld [vmem:[%s757_s4] sm:$0xff] }
   0x5   :  { %503 = vmatprep.subr.bf16.mxu0 %v570_v2 }
   0x6   :  { %14 = vsyncpa [#allocation3], 0  ;;  %v34_v11 = vld [vmem:[%s754_s1] sm:$0xff]  ;;  %v507_v12 = vpack.c.bf16 %v120_v10, %v119_v9  ;;  %v121_v13 = vld [vmem:[%s757_s4 + $0x10] sm:$0xff]  ;;  %vm202_vm2 = vcmask 523264   ;;  %s573_s21 = smov [#allocation2]  }
   0x7   :  { %437 = vmatmul.mubr.msk.f32.vlgmr.msra.gmra.mrb[0].mxu0 %vm44_vm1, %v33_v7  ;;  %v122_v14 = vld [vmem:[%s757_s4 + $0x18] sm:$0xff]  ;;  %v123_v16 = vld [vmem:[%s757_s4 + $0x20] sm:$0xff]  ;;  %v124_v17 = vld [vmem:[%s757_s4 + $0x28] sm:$0xff]  ;;  %s386_s5 = sshll.u32 %s573_s21, 4  ;;  %vm378_vm3 = vcmask 64512   ;;  %s387_s5 = int_to_ptr.vmem [resolvable:$true] %s386_s5 }
   0x8   :  { %505 = vmatpush3.bf16.msra.mxu0 %v504_v8  ;;  %443 = vmatprep.mubr.msk.f32.mxu0 %vm571_vm0, %v572_v4  ;;  %v510_v15 = vpack.c.bf16 %v122_v14, %v121_v13  ;;  %v513_v18 = vpack.c.bf16 %v124_v17, %v123_v16  ;;  %v125_v19 = vld [vmem:[%s757_s4 + $0x30] sm:$0xff]  ;;  %v126_v20 = vld [vmem:[%s757_s4 + $0x38] sm:$0xff]  ;;  %v285_v22 = vld [vmem:[%s760_s7] sm:$0xff]  ;;  %p551_p1 = scmp.lt.s32.totalorder %s387_s5, %s387_s5 }
   0x9   :  { %506 = vmatprep.subr.bf16.mxu0 %v570_v2  ;;  %v516_v21 = vpack.c.bf16 %v126_v20, %v125_v19  ;;  %v286_v23 = vld [vmem:[%s760_s7 + $0x8] sm:$0xff]  ;;  %v287_v24 = vld [vmem:[%s760_s7 + $0x10] sm:$0xff]  ;;  %v288_v26 = vld [vmem:[%s760_s7 + $0x18] sm:$0xff] }
   0xa   :  { %v519_v25 = vpack.c.bf16 %v286_v23, %v285_v22  ;;  %v522_v27 = vpack.c.bf16 %v288_v26, %v287_v24  ;;  %v289_v28 = vld [vmem:[%s760_s7 + $0x20] sm:$0xff]  ;;  %v290_v29 = vld [vmem:[%s760_s7 + $0x28] sm:$0xff]  ;;  %v291_v31 = vld [vmem:[%s760_s7 + $0x30] sm:$0xff] }
   0xb   :  { %444 = vmatmul.mubr.msk.f32.vlgmr.msra.gmra.mrb[2].mxu0 %vm44_vm1, %v34_v11  ;;  %v525_v30 = vpack.c.bf16 %v290_v29, %v289_v28  ;;  %v292_v32 = vld [vmem:[%s760_s7 + $0x38] sm:$0xff]  ;;  %v293_v34 = vld [vmem:[%s760_s7 + $0x40] sm:$0xff]  ;;  %v294_v35 = vld [vmem:[%s760_s7 + $0x48] sm:$0xff] }
   0xc   :  { %508 = vmatpush3.bf16.msra.mxu0 %v507_v12  ;;  %462 = vmatprep.mubr.msk.f32.mxu0 %vm571_vm0, %v572_v4  ;;  %v528_v33 = vpack.c.bf16 %v292_v32, %v291_v31  ;;  %v531_v36 = vpack.c.bf16 %v294_v35, %v293_v34  ;;  %v295_v37 = vld [vmem:[%s760_s7 + $0x50] sm:$0xff]  ;;  %v296_v38 = vld [vmem:[%s760_s7 + $0x58] sm:$0xff]  ;;  %v394_v40 = vld [vmem:[%s756_s3] ss:$0 sm:$0xff] }
   0xd   :  { %509 = vmatprep.subr.bf16.mxu0 %v570_v2  ;;  %520 = vmatpush3.bf16.msra.mxu1 %v519_v25  ;;  %v534_v39 = vpack.c.bf16 %v296_v38, %v295_v37  ;;  %v297_v47 = vld [vmem:[%s760_s7 + $0x60] sm:$0xff]  ;;  %v298_v48 = vld [vmem:[%s760_s7 + $0x68] sm:$0xff]  ;;  %v299_v50 = vld [vmem:[%s760_s7 + $0x70] sm:$0xff] }
   0xe   :  { %521 = vmatprep.subr.bf16.mxu1 %v570_v2  ;;  %v537_v49 = vpack.c.bf16 %v298_v48, %v297_v47  ;;  %v300_v51 = vld [vmem:[%s760_s7 + $0x78] sm:$0xff]  ;;  %v398_v54 = vld [vmem:[%s759_s6] ss:$0 sm:$0xff]  ;;  %s546_s7 = scalar_lea.vmem %s387_s5, 128 }
   0xf   :  { %v540_v52 = vpack.c.bf16 %v300_v51, %v299_v50  ;;  %v399_v59 = vld [vmem:[%s761_s8] ss:$0 sm:$0xff]  ;;  %p547_p0 = scmp.ne.s32.totalorder %s387_s5, %s546_s7  ;;  %p552_p2 = scmp.lt.s32.totalorder %s546_s7, %s546_s7 }
  0x10   :  { %511 = vmatpush3.bf16.msra.mxu0 %v510_v15 }
  0x11   :  { %512 = vmatprep.subr.bf16.mxu0 %v570_v2  ;;  %523 = vmatpush3.bf16.msra.mxu1 %v522_v27  ;;  %p553_p3 = por %p552_p2, %p551_p1 }
  0x12   :  { %524 = vmatprep.subr.bf16.mxu1 %v570_v2 }
  0x13   :  { %p554_p4 = pnand %p553_p3, %p547_p0 }
  0x14   :  { %514 = vmatpush3.bf16.msra.mxu0 %v513_v18 }
  0x15   :  { %515 = vmatprep.subr.bf16.mxu0 %v570_v2  ;;  %526 = vmatpush3.bf16.msra.mxu1 %v525_v30 }
  0x16   :  { %527 = vmatprep.subr.bf16.mxu1 %v570_v2 }
  0x18   :  { %517 = vmatpush3.bf16.msra.mxu0 %v516_v21 }
  0x19   :  { %529 = vmatpush3.bf16.msra.mxu1 %v528_v33 }
  0x1a   :  { %530 = vmatprep.subr.bf16.mxu1 %v570_v2 }
  0x1d   :  { %532 = vmatpush3.bf16.msra.mxu1 %v531_v36 }
  0x1e   :  { %533 = vmatprep.subr.bf16.mxu1 %v570_v2 }
  0x21   :  { %535 = vmatpush3.bf16.msra.mxu1 %v534_v39 }
  0x22   :  { %536 = vmatprep.subr.bf16.mxu1 %v570_v2 }
  0x25   :  { %538 = vmatpush3.bf16.msra.mxu1 %v537_v49 }
  0x26   :  { %539 = vmatprep.subr.bf16.mxu1 %v570_v2 }
  0x29   :  { %541 = vmatpush3.bf16.msra.mxu1 %v540_v52 }
  0xda   :  { %v114_v41 = vpop.f32.mrb[0].mxu0 }
  0xdb   :  { %v115_v42 = vadd.f32 %v394_v40, %v114_v41  ;;  %v438_v43 = vpop.f32.mrb[1].mxu0 }
  0xdd   :  { %v118_v44 = vmax.f32 %v115_v42, 0.0 }
  0xde   :  { %v198_v45 = vpop.f32.mrb[2].mxu0 }
  0xdf   :  { %463 = vmatmul.mubr.msk.f32.vlgmr.msra.gmra.mrb[4].mxu0 %vm202_vm2, %v118_v44  ;;  %v445_v46 = vpop.f32.mrb[3].mxu0 }
 0x1b2   :  { %v272_v53 = vpop.f32.mrb[4].mxu0 }
 0x1b3   :  { %v273_v55 = vadd.f32 %v272_v53, %v198_v45  ;;  %v464_v56 = vpop.f32.mrb[5].mxu0 }
 0x1b5   :  { %v283_v57 = vadd.f32 %v398_v54, %v273_v55 }
 0x1b7   :  { %v284_v58 = vmax.f32 %v283_v57, 0.0 }
 0x1b9   :  { %498 = vmatmul.mubr.f32.vlgmr.msra.gmra.mrb[0].mxu1 %v284_v58 }
 0x28c   :  { %v374_v60 = vpop.f32.mrb[0].mxu1 }
 0x28d   :  { %v375_v61 = vadd.f32 %v399_v59, %v374_v60  ;;  %v499_v62 = vpop.f32.mrb[1].mxu1 }
 0x28f   :  { %379 = vst.msk [vmem:[#allocation2] sm:$0xff] %vm378_vm3, %v375_v61 }
 0x290   :  { %557 = shalt.err (!%p554_p4)
}
 0x291   :  { %s558_s0 = scalar_lea.hbm %s762_s9, 128 }
 0x292   :  { %p559_p5 = scmp.ne.s32.totalorder %s762_s9, %s558_s0  ;;  %p562_p6 = scmp.lt.u32.totalorder %s558_s0, %s762_s9 }
 0x294   :  { %p564_p7 = pnand %p562_p6, %p559_p5 }
 0x296   :  { %567 = shalt.err (!%p564_p7)
}
 0x297   :  { %389 = dma.vmem_to_hbm [thread:$0]  %s387_s5, 128, %s762_s9, [#allocation3]  }
 0x298   :  { %568 = dma.done.wait [#allocation3], 128  }
 0x299   :  { %569 = vsyncadd [#allocation3], 4294967168 }
 0x29a   :  { %393 = vsyncpa [#allocation3], 1 }

</bundles_post_ra>
